<compile_context>
chip_gen: v6e
topology: v6e:2x2x1
jax: 0.10.0
libtpu: 0.0.40
codegen_flags: <defaults>
</compile_context>

<pallas_src>
import math
import functools

import jax
import jax.numpy as jnp
from jax.experimental import pallas as pl
from jax.experimental.pallas import tpu as pltpu


SMEM_SPEC = pl.BlockSpec(memory_space=pltpu.MemorySpace.SMEM)   # whole array in SMEM
VMEM_LIMIT = 32 * 1024 * 1024          # safe on v5e/v6e/v7x, above v5e's 16 MiB default
_DN = (((1,), (1,)), ((), ()))         # x(m, K) . w(N, K) -> (m, N)  ==  x @ w.T


# ----------------------------------------------------------------------------- kernels

def _qc_qkv_self_kernel(jsq_ref, xa_ref, xb_ref, wa_ref, wb_ref, ba_ref, bb_ref,
                        qa_ref, qb_ref, ka_ref, kb_ref, va_ref, vb_ref):
    """Fused self-attention Q/K/V QCMatrixLinear projections.

    Reads the (row-tiled) activation once and applies all three projections:
        out_a = x_a @ Wa^T + b_a + j^2 * (x_b @ Wb^T)
        out_b = x_a @ Wb^T + b_b +        x_b @ Wa^T
    Weights are bf16 and VMEM-resident; accumulation is f32 on the MXU.
    """
    jsq = jsq_ref[0]                                 # j^2 = -1 + sin(2*layer_theta)
    xa = xa_ref[...].astype(jnp.bfloat16)            # cast in-kernel (x stays f32 in HBM)
    xb = xb_ref[...].astype(jnp.bfloat16)
    outs = ((qa_ref, qb_ref), (ka_ref, kb_ref), (va_ref, vb_ref))
    for p in range(3):                               # unrolled: q, k, v
        wa = wa_ref[p]                               # (Dout, Din) bf16
        wb = wb_ref[p]
        a_wa = jax.lax.dot_general(xa, wa, _DN, preferred_element_type=jnp.float32)
        a_wb = jax.lax.dot_general(xa, wb, _DN, preferred_element_type=jnp.float32)
        b_wa = jax.lax.dot_general(xb, wa, _DN, preferred_element_type=jnp.float32)
        b_wb = jax.lax.dot_general(xb, wb, _DN, preferred_element_type=jnp.float32)
        outs[p][0][...] = (a_wa + jsq * b_wb + ba_ref[p]).astype(outs[p][0].dtype)
        outs[p][1][...] = (a_wb + b_wa + bb_ref[p]).astype(outs[p][1].dtype)


def _qc_linear_kernel(jsq_ref, xa_ref, xb_ref, wa_ref, wb_ref, ba_ref, bb_ref,
                      oa_ref, ob_ref):
    """Single QCMatrixLinear (output projection / cross-attention Q,K,V), row-tiled."""
    jsq = jsq_ref[0]
    xa = xa_ref[...].astype(jnp.bfloat16)
    xb = xb_ref[...].astype(jnp.bfloat16)
    wa = wa_ref[...]                                 # (Dout, Din) bf16, resident
    wb = wb_ref[...]
    a_wa = jax.lax.dot_general(xa, wa, _DN, preferred_element_type=jnp.float32)
    a_wb = jax.lax.dot_general(xa, wb, _DN, preferred_element_type=jnp.float32)
    b_wa = jax.lax.dot_general(xb, wa, _DN, preferred_element_type=jnp.float32)
    b_wb = jax.lax.dot_general(xb, wb, _DN, preferred_element_type=jnp.float32)
    oa_ref[...] = (a_wa + jsq * b_wb + ba_ref[...]).astype(oa_ref.dtype)
    ob_ref[...] = (a_wb + b_wa + bb_ref[...]).astype(ob_ref.dtype)


def _qc_flash_attn_kernel(hjsq_ref, mask_ref,
                          qa_ref, qb_ref, ka_ref, kb_ref, va_ref, vb_ref,
                          oa_ref, ob_ref,
                          m_scr, l_scr, acca_scr, accb_scr, *, scale):
    """Flash-style QC attention.  Grid = (B, H, S/tq, S/tk); key axis is last."""
    h = pl.program_id(1)
    ki = pl.program_id(3)
    nk = pl.num_programs(3)

    @pl.when(ki == 0)
    def _init():
        m_scr[...] = jnp.full_like(m_scr, -jnp.inf)
        l_scr[...] = jnp.zeros_like(l_scr)
        acca_scr[...] = jnp.zeros_like(acca_scr)
        accb_scr[...] = jnp.zeros_like(accb_scr)

    jsq = hjsq_ref[h]                                # per-head j^2 = -1 + sin(2*theta_h)
    mask = mask_ref[0]                               # (1, tk) -> broadcast over queries
    qa = qa_ref[0, 0]                                # (tq, Dh) bf16
    qb = qb_ref[0, 0]
    ka = ka_ref[0, 0]                                # (tk, Dh) bf16
    kb = kb_ref[0, 0]

    s_aa = jax.lax.dot_general(qa, ka, _DN, preferred_element_type=jnp.float32)
    s_ab = jax.lax.dot_general(qa, kb, _DN, preferred_element_type=jnp.float32)
    s_ba = jax.lax.dot_general(qb, ka, _DN, preferred_element_type=jnp.float32)
    s_bb = jax.lax.dot_general(qb, kb, _DN, preferred_element_type=jnp.float32)
    scores_a = s_aa + jsq * s_bb
    scores_b = s_ab + s_ba
    mag = jnp.sqrt(scores_a * scores_a + scores_b * scores_b + 1e-8) * scale
    mag = jnp.where(mask == 0.0, -1e9, mag)

    m_prev = m_scr[...]                              # (tq, 1)
    m_new = jnp.maximum(m_prev, jnp.max(mag, axis=-1, keepdims=True))
    alpha = jnp.exp(m_prev - m_new)
    p = jnp.exp(mag - m_new)                         # (tq, tk) f32
    l_scr[...] = alpha * l_scr[...] + jnp.sum(p, axis=-1, keepdims=True)
    m_scr[...] = m_new
    p_b = p.astype(jnp.bfloat16)                     # bf16 MXU operand, f32 accumulate
    acca_scr[...] = alpha * acca_scr[...] + jnp.dot(
        p_b, va_ref[0, 0], preferred_element_type=jnp.float32)
    accb_scr[...] = alpha * accb_scr[...] + jnp.dot(
        p_b, vb_ref[0, 0], preferred_element_type=jnp.float32)

    @pl.when(ki == nk - 1)
    def _finalize():
        inv_l = pl.reciprocal(l_scr[...], approx=True)     # EUP slot, ~free
        oa_ref[0, 0] = (acca_scr[...] * inv_l).astype(oa_ref.dtype)
        ob_ref[0, 0] = (accb_scr[...] * inv_l).astype(ob_ref.dtype)


# ----------------------------------------------------------------------------- wrappers

def _pick_tile(n, target):
    if n <= target:
        return n
    for t in (target, 512, 256, 128, 64, 32, 16, 8):
        if t <= target and n % t == 0:
            return t
    return n


def qc_qkv_self_proj(xa, xb, wa, wb, ba, bb, jsq, *, row_tile=256):
    """Fused Q/K/V projection for the self-attention case (x_q is x_k is x_v)."""
    B, S, Din = xa.shape
    Dout = wa.shape[1]
    M = B * S
    tm = _pick_tile(M, row_tile)
    x_spec = pl.BlockSpec((tm, Din), lambda i: (i, 0))
    w_spec = pl.BlockSpec((3, Dout, Din), lambda i: (0, 0, 0))    # VMEM-resident
    b_spec = pl.BlockSpec((3, 1, Dout), lambda i: (0, 0, 0))
    o_spec = pl.BlockSpec((tm, Dout), lambda i: (i, 0))
    outs = pl.pallas_call(
        _qc_qkv_self_kernel,
        out_shape=(jax.ShapeDtypeStruct((M, Dout), jnp.bfloat16),) * 6,
        grid=(M // tm,),
        in_specs=[SMEM_SPEC, x_spec, x_spec, w_spec, w_spec, b_spec, b_spec],
        out_specs=(o_spec,) * 6,
        compiler_params=pltpu.CompilerParams(
            dimension_semantics=("parallel",), vmem_limit_bytes=VMEM_LIMIT),
    )(jsq, xa.reshape(M, Din), xb.reshape(M, Din), wa, wb, ba, bb)
    return tuple(o.reshape(B, S, Dout) for o in outs)


def qc_linear(xa, xb, wa, wb, ba, bb, jsq, *, row_tile=256, out_dtype=jnp.float32):
    """Single QCMatrixLinear, row-tiled over B*S."""
    B, S, Din = xa.shape
    Dout = wa.shape[0]
    M = B * S
    tm = _pick_tile(M, row_tile)
    x_spec = pl.BlockSpec((tm, Din), lambda i: (i, 0))
    w_spec = pl.BlockSpec((Dout, Din), lambda i: (0, 0))
    b_spec = pl.BlockSpec((1, Dout), lambda i: (0, 0))
    o_spec = pl.BlockSpec((tm, Dout), lambda i: (i, 0))
    oa, ob = pl.pallas_call(
        _qc_linear_kernel,
        out_shape=(jax.ShapeDtypeStruct((M, Dout), out_dtype),) * 2,
        grid=(M // tm,),
        in_specs=[SMEM_SPEC, x_spec, x_spec, w_spec, w_spec, b_spec, b_spec],
        out_specs=(o_spec,) * 2,
        compiler_params=pltpu.CompilerParams(
            dimension_semantics=("parallel",), vmem_limit_bytes=VMEM_LIMIT),
    )(jsq, xa.reshape(M, Din), xb.reshape(M, Din), wa, wb, ba, bb)
    return oa.reshape(B, S, Dout), ob.reshape(B, S, Dout)


def qc_attention(qa, qb, ka, kb, va, vb, mask, head_jsq, *, q_tile=256, k_tile=256):
    """Flash QC attention on (B, H, S, Dh) inputs; returns (B, H, S, Dh) bf16 x2."""
    B, H, S, Dh = qa.shape
    tq = _pick_tile(S, q_tile)
    tk = _pick_tile(S, k_tile)
    q_spec = pl.BlockSpec((1, 1, tq, Dh), lambda b, h, qi, ki: (b, h, qi, 0))
    k_spec = pl.BlockSpec((1, 1, tk, Dh), lambda b, h, qi, ki: (b, h, ki, 0))
    m_spec = pl.BlockSpec((1, 1, tk), lambda b, h, qi, ki: (b, 0, ki))
    o_spec = pl.BlockSpec((1, 1, tq, Dh), lambda b, h, qi, ki: (b, h, qi, 0))
    kernel = functools.partial(_qc_flash_attn_kernel, scale=1.0 / math.sqrt(Dh))
    return pl.pallas_call(
        kernel,
        out_shape=(jax.ShapeDtypeStruct((B, H, S, Dh), jnp.bfloat16),) * 2,
        grid=(B, H, S // tq, S // tk),
        in_specs=[SMEM_SPEC, m_spec, q_spec, q_spec, k_spec, k_spec, k_spec, k_spec],
        out_specs=(o_spec,) * 2,
        scratch_shapes=[pltpu.VMEM((tq, 1), jnp.float32),
                        pltpu.VMEM((tq, 1), jnp.float32),
                        pltpu.VMEM((tq, Dh), jnp.float32),
                        pltpu.VMEM((tq, Dh), jnp.float32)],
        compiler_params=pltpu.CompilerParams(
            dimension_semantics=("parallel", "parallel", "parallel", "arbitrary"),
            vmem_limit_bytes=VMEM_LIMIT),
    )(head_jsq, mask, qa, qb, ka, kb, va, vb)


# ----------------------------------------------------------------------------- module

def qc_mha_forward(params, xq_a, xq_b, xk_a, xk_b, xv_a, xv_b, mask, layer_theta,
                   *, n_heads):
    """QCMatrixMultiHeadAttention.forward (dropout = inference identity)."""
    jsq = (-1.0 + jnp.sin(2.0 * layer_theta)).reshape(1).astype(jnp.float32)
    head_jsq = (-1.0 + jnp.sin(2.0 * params["head_thetas"])).astype(jnp.float32)

    bf = lambda t: t.astype(jnp.bfloat16)
    qkv_wa = bf(params["qkv_wa"])
    qkv_wb = bf(params["qkv_wb"])

    self_attn = (xq_a is xk_a) and (xq_a is xv_a) and (xq_b is xk_b) and (xq_b is xv_b)
    if self_attn:
        qa, qb, ka, kb, va, vb = qc_qkv_self_proj(
            xq_a, xq_b, qkv_wa, qkv_wb, params["qkv_ba"], params["qkv_bb"], jsq)
    else:
        qa, qb = qc_linear(xq_a, xq_b, qkv_wa[0], qkv_wb[0], params["qkv_ba"][0],
                           params["qkv_bb"][0], jsq, out_dtype=jnp.bfloat16)
        ka, kb = qc_linear(xk_a, xk_b, qkv_wa[1], qkv_wb[1], params["qkv_ba"][1],
                           params["qkv_bb"][1], jsq, out_dtype=jnp.bfloat16)
        va, vb = qc_linear(xv_a, xv_b, qkv_wa[2], qkv_wb[2], params["qkv_ba"][2],
                           params["qkv_bb"][2], jsq, out_dtype=jnp.bfloat16)

    B, S, D = qa.shape
    H = n_heads
    Dh = D // H
    if mask is None:
        mask = jnp.ones((B, 1, S), jnp.float32)

    to_heads = lambda t: t.reshape(B, S, H, Dh).transpose(0, 2, 1, 3)     # layout plumbing
    att_a, att_b = qc_attention(to_heads(qa), to_heads(qb), to_heads(ka), to_heads(kb),
                                to_heads(va), to_heads(vb), mask, head_jsq)
    from_heads = lambda t: t.transpose(0, 2, 1, 3).reshape(B, S, D)

    return qc_linear(from_heads(att_a), from_heads(att_b),
                     bf(params["o_wa"]), bf(params["o_wb"]),
                     params["o_ba"], params["o_bb"], jsq, out_dtype=jnp.float32)


# ----------------------------------------------------------------------------- references

def _mm_bf16(x, y):
    """Matched MXU precision: bf16 operands, f32 accumulation."""
    return jnp.matmul(x.astype(jnp.bfloat16), y.astype(jnp.bfloat16),
                      preferred_element_type=jnp.float32)


def _mm_f32(x, y):
    """Exact float32 matmul."""
    return jnp.matmul(x, y, precision=jax.lax.Precision.HIGHEST)


def reference_forward(params, xq_a, xq_b, xk_a, xk_b, xv_a, xv_b, mask, layer_theta,
                      n_heads, matmul):
    """Pure-JAX transcription of the PyTorch module (plain softmax, 4-matmul form)."""
    jsq = -1.0 + jnp.sin(2.0 * layer_theta)

    def lin(xa, xb, wa, wb, ba, bb):
        oa = matmul(xa, wa.T) + ba + matmul(xb, wb.T) * jsq
        ob = matmul(xa, wb.T) + bb + matmul(xb, wa.T)
        return oa, ob

    qa, qb = lin(xq_a, xq_b, params["qkv_wa"][0], params["qkv_wb"][0],
                 params["qkv_ba"][0, 0], params["qkv_bb"][0, 0])
    ka, kb = lin(xk_a, xk_b, params["qkv_wa"][1], params["qkv_wb"][1],
                 params["qkv_ba"][1, 0], params["qkv_bb"][1, 0])
    va, vb = lin(xv_a, xv_b, params["qkv_wa"][2], params["qkv_wb"][2],
                 params["qkv_ba"][2, 0], params["qkv_bb"][2, 0])
    B, S, D = qa.shape
    Dh = D // n_heads

    def split(x):
        return x.reshape(B, S, n_heads, Dh).transpose(0, 2, 1, 3)

    qa_h, qb_h, ka_h, kb_h, va_h, vb_h = map(split, (qa, qb, ka, kb, va, vb))
    jsq_h = (-1.0 + jnp.sin(2.0 * params["head_thetas"])).reshape(1, n_heads, 1, 1)
    kaT = ka_h.transpose(0, 1, 3, 2)
    kbT = kb_h.transpose(0, 1, 3, 2)
    sa = matmul(qa_h, kaT) + matmul(qb_h, kbT) * jsq_h
    sb = matmul(qa_h, kbT) + matmul(qb_h, kaT)
    mag = jnp.sqrt(sa * sa + sb * sb + 1e-8) / math.sqrt(Dh)
    mag = jnp.where(mask[:, None, :, :] == 0.0, -1e9, mag)
    attn = jax.nn.softmax(mag, axis=-1)
    oa_h = matmul(attn, va_h)
    ob_h = matmul(attn, vb_h)

    def merge(x):
        return x.transpose(0, 2, 1, 3).reshape(B, S, D)

    return lin(merge(oa_h), merge(ob_h), params["o_wa"], params["o_wb"],
               params["o_ba"][0], params["o_bb"][0])


# ----------------------------------------------------------------------------- init

def _xavier_uniform(key, shape):
    fan_out, fan_in = shape
    limit = math.sqrt(6.0 / (fan_in + fan_out))
    return jax.random.uniform(key, shape, jnp.float32, -limit, limit)


def init_params(key, cfg):
    D = cfg["embed_dim"]
    H = cfg["n_heads"]
    ks = jax.random.split(key, 8)
    return dict(
        qkv_wa=jnp.stack([_xavier_uniform(ks[i], (D, D)) for i in range(3)]),
        qkv_wb=jnp.stack([_xavier_uniform(ks[3 + i], (D, D)) for i in range(3)]),
        qkv_ba=jnp.zeros((3, 1, D), jnp.float32),
        qkv_bb=jnp.zeros((3, 1, D), jnp.float32),
        o_wa=_xavier_uniform(ks[6], (D, D)),
        o_wb=_xavier_uniform(ks[7], (D, D)),
        o_ba=jnp.zeros((1, D), jnp.float32),
        o_bb=jnp.zeros((1, D), jnp.float32),
        head_thetas=jnp.full((H,), cfg["initial_theta"], jnp.float32),
    )


# ----------------------------------------------------------------------------- main

if __name__ == "__main__":
    cfg = dict(embed_dim=32, n_heads=4, dropout_prob=0.1, initial_theta=0.5)
    B, S, D = 2, 8, cfg["embed_dim"]

    key = jax.random.PRNGKey(0)
    k_params, k_a, k_b = jax.random.split(key, 3)
    params = init_params(k_params, cfg)

    x_a = jax.random.normal(k_a, (B, S, D), jnp.float32)
    x_b = 0.1 * jax.random.normal(k_b, (B, S, D), jnp.float32)
    mask = jnp.ones((B, 1, S), jnp.float32).at[1, 0, 6:].set(0.0)  # pad last 2 keys of b=1
    layer_theta = jnp.asarray(cfg["initial_theta"], jnp.float32)

    # self-attention: x_q = x_k = x_v (the module also supports distinct inputs)
    out_a, out_b = qc_mha_forward(params, x_a, x_b, x_a, x_b, x_a, x_b,
                                  mask, layer_theta, n_heads=cfg["n_heads"])
    out_a, out_b = jax.block_until_ready((out_a, out_b))

    # Matched-precision reference (bf16 MXU operands, f32 accumulation -- same
    # arithmetic the kernels use) -> tight tolerance.
    ref_a, ref_b = reference_forward(params, x_a, x_b, x_a, x_b, x_a, x_b,
                                     mask, layer_theta, cfg["n_heads"], _mm_bf16)
    # Exact float32 reference -> coarse structural sanity check (a real indexing /
    # masking bug would produce O(1) errors; bf16 MXU rounding stays well below 0.25).
    f32_a, f32_b = reference_forward(params, x_a, x_b, x_a, x_b, x_a, x_b,
                                     mask, layer_theta, cfg["n_heads"], _mm_f32)

    assert out_a.shape == (B, S, D) and out_b.shape == (B, S, D)
    assert out_a.dtype == jnp.float32 and out_b.dtype == jnp.float32
    assert bool(jnp.all(jnp.isfinite(out_a))) and bool(jnp.all(jnp.isfinite(out_b)))
    assert bool(jnp.allclose(out_a, ref_a, atol=2e-2, rtol=2e-2)), "out_a mismatch (matched)"
    assert bool(jnp.allclose(out_b, ref_b, atol=2e-2, rtol=2e-2)), "out_b mismatch (matched)"
    assert bool(jnp.allclose(out_a, f32_a, atol=0.25, rtol=0.25)), "out_a mismatch (f32 sanity)"
    assert bool(jnp.allclose(out_b, f32_b, atol=0.25, rtol=0.25)), "out_b mismatch (f32 sanity)"
    print("KERNEL_OK")
</pallas_src>

<mosaic_0001>
module attributes {stable_mosaic.version = 11 : i64} {
  func.func @_qc_qkv_self_kernel(%arg0: i32, %arg1: memref<1xf32, #tpu.memory_space<smem>>, %arg2: memref<16x32xf32, #tpu.memory_space<vmem>>, %arg3: memref<16x32xf32, #tpu.memory_space<vmem>>, %arg4: memref<3x32x32xbf16, #tpu.memory_space<vmem>>, %arg5: memref<3x32x32xbf16, #tpu.memory_space<vmem>>, %arg6: memref<3x1x32xf32, #tpu.memory_space<vmem>>, %arg7: memref<3x1x32xf32, #tpu.memory_space<vmem>>, %arg8: memref<16x32xbf16, #tpu.memory_space<vmem>>, %arg9: memref<16x32xbf16, #tpu.memory_space<vmem>>, %arg10: memref<16x32xbf16, #tpu.memory_space<vmem>>, %arg11: memref<16x32xbf16, #tpu.memory_space<vmem>>, %arg12: memref<16x32xbf16, #tpu.memory_space<vmem>>, %arg13: memref<16x32xbf16, #tpu.memory_space<vmem>>) attributes {dimension_semantics = [#tpu.dimension_semantics<parallel>], iteration_bounds = array<i64: 1>, scalar_prefetch = 0 : i64, scratch_operands = 0 : i64, tpu.core_type = #tpu.core_type<tc>, window_params = [{transform_indices = @transform_0, window_bounds = array<i64: 1>}, {transform_indices = @transform_1, window_bounds = array<i64: 16, 32>}, {transform_indices = @transform_2, window_bounds = array<i64: 16, 32>}, {pipeline_mode = #tpu.pipeline_mode<synchronous>, transform_indices = @transform_3, window_bounds = array<i64: 3, 32, 32>}, {pipeline_mode = #tpu.pipeline_mode<synchronous>, transform_indices = @transform_4, window_bounds = array<i64: 3, 32, 32>}, {pipeline_mode = #tpu.pipeline_mode<synchronous>, transform_indices = @transform_5, window_bounds = array<i64: 3, 1, 32>}, {pipeline_mode = #tpu.pipeline_mode<synchronous>, transform_indices = @transform_6, window_bounds = array<i64: 3, 1, 32>}, {transform_indices = @transform_7, window_bounds = array<i64: 16, 32>}, {transform_indices = @transform_8, window_bounds = array<i64: 16, 32>}, {transform_indices = @transform_9, window_bounds = array<i64: 16, 32>}, {transform_indices = @transform_10, window_bounds = array<i64: 16, 32>}, {transform_indices = @transform_11, window_bounds = array<i64: 16, 32>}, {transform_indices = @transform_12, window_bounds = array<i64: 16, 32>}]} {
    %c0 = arith.constant 0 : index
    %0 = memref.load %arg1[%c0] : memref<1xf32, #tpu.memory_space<smem>>
    %c0_0 = arith.constant 0 : index
    %c0_1 = arith.constant 0 : index
    %1 = vector.load %arg2[%c0_0, %c0_1] : memref<16x32xf32, #tpu.memory_space<vmem>>, vector<16x32xf32>
    %2 = arith.truncf %1 : vector<16x32xf32> to vector<16x32xbf16>
    %c0_2 = arith.constant 0 : index
    %c0_3 = arith.constant 0 : index
    %3 = vector.load %arg3[%c0_2, %c0_3] : memref<16x32xf32, #tpu.memory_space<vmem>>, vector<16x32xf32>
    %4 = arith.truncf %3 : vector<16x32xf32> to vector<16x32xbf16>
    %c0_4 = arith.constant 0 : index
    %c0_5 = arith.constant 0 : index
    %c0_6 = arith.constant 0 : index
    %5 = vector.load %arg4[%c0_4, %c0_5, %c0_6] : memref<3x32x32xbf16, #tpu.memory_space<vmem>>, vector<1x32x32xbf16>
    %6 = vector.shape_cast %5 : vector<1x32x32xbf16> to vector<32x32xbf16>
    %c0_7 = arith.constant 0 : index
    %c0_8 = arith.constant 0 : index
    %c0_9 = arith.constant 0 : index
    %7 = vector.load %arg5[%c0_7, %c0_8, %c0_9] : memref<3x32x32xbf16, #tpu.memory_space<vmem>>, vector<1x32x32xbf16>
    %8 = vector.shape_cast %7 : vector<1x32x32xbf16> to vector<32x32xbf16>
    %cst = arith.constant dense<0.000000e+00> : vector<16x32xf32>
    %9 = tpu.matmul %2, %6, %cst {dimension_numbers = #tpu.dot_dimension_numbers<[1], [1], [0], [0], [0, 0, 1, 0], [], []>} : vector<16x32xbf16>, vector<32x32xbf16>, vector<16x32xf32> -> vector<16x32xf32>
    %cst_10 = arith.constant dense<0.000000e+00> : vector<16x32xf32>
    %10 = tpu.matmul %2, %8, %cst_10 {dimension_numbers = #tpu.dot_dimension_numbers<[1], [1], [0], [0], [0, 0, 1, 0], [], []>} : vector<16x32xbf16>, vector<32x32xbf16>, vector<16x32xf32> -> vector<16x32xf32>
    %cst_11 = arith.constant dense<0.000000e+00> : vector<16x32xf32>
    %11 = tpu.matmul %4, %6, %cst_11 {dimension_numbers = #tpu.dot_dimension_numbers<[1], [1], [0], [0], [0, 0, 1, 0], [], []>} : vector<16x32xbf16>, vector<32x32xbf16>, vector<16x32xf32> -> vector<16x32xf32>
    %cst_12 = arith.constant dense<0.000000e+00> : vector<16x32xf32>
    %12 = tpu.matmul %4, %8, %cst_12 {dimension_numbers = #tpu.dot_dimension_numbers<[1], [1], [0], [0], [0, 0, 1, 0], [], []>} : vector<16x32xbf16>, vector<32x32xbf16>, vector<16x32xf32> -> vector<16x32xf32>
    %13 = vector.broadcast %0 : f32 to vector<16x32xf32>
    %14 = arith.mulf %13, %12 : vector<16x32xf32>
    %15 = arith.addf %9, %14 : vector<16x32xf32>
    %c0_13 = arith.constant 0 : index
    %c0_14 = arith.constant 0 : index
    %c0_15 = arith.constant 0 : index
    %16 = vector.load %arg6[%c0_13, %c0_14, %c0_15] : memref<3x1x32xf32, #tpu.memory_space<vmem>>, vector<1x1x32xf32>
    %17 = vector.shape_cast %16 : vector<1x1x32xf32> to vector<1x32xf32>
    %18 = vector.broadcast %17 : vector<1x32xf32> to vector<16x32xf32>
    %19 = arith.addf %15, %18 : vector<16x32xf32>
    %20 = arith.truncf %19 : vector<16x32xf32> to vector<16x32xbf16>
    %c0_16 = arith.constant 0 : index
    %c0_17 = arith.constant 0 : index
    %21 = vector.load %arg8[%c0_16, %c0_17] : memref<16x32xbf16, #tpu.memory_space<vmem>>, vector<16x32xbf16>
    tpu.vector_store %arg8[%c0_16, %c0_17], %20 {strides = array<i32>} : memref<16x32xbf16, #tpu.memory_space<vmem>>, vector<16x32xbf16>,
    %22 = arith.addf %10, %11 : vector<16x32xf32>
    %c0_18 = arith.constant 0 : index
    %c0_19 = arith.constant 0 : index
    %c0_20 = arith.constant 0 : index
    %23 = vector.load %arg7[%c0_18, %c0_19, %c0_20] : memref<3x1x32xf32, #tpu.memory_space<vmem>>, vector<1x1x32xf32>
    %24 = vector.shape_cast %23 : vector<1x1x32xf32> to vector<1x32xf32>
    %25 = vector.broadcast %24 : vector<1x32xf32> to vector<16x32xf32>
    %26 = arith.addf %22, %25 : vector<16x32xf32>
    %27 = arith.truncf %26 : vector<16x32xf32> to vector<16x32xbf16>
    %c0_21 = arith.constant 0 : index
    %c0_22 = arith.constant 0 : index
    %28 = vector.load %arg9[%c0_21, %c0_22] : memref<16x32xbf16, #tpu.memory_space<vmem>>, vector<16x32xbf16>
    tpu.vector_store %arg9[%c0_21, %c0_22], %27 {strides = array<i32>} : memref<16x32xbf16, #tpu.memory_space<vmem>>, vector<16x32xbf16>,
    %c1 = arith.constant 1 : index
    %c0_23 = arith.constant 0 : index
    %c0_24 = arith.constant 0 : index
    %29 = vector.load %arg4[%c1, %c0_23, %c0_24] : memref<3x32x32xbf16, #tpu.memory_space<vmem>>, vector<1x32x32xbf16>
    %30 = vector.shape_cast %29 : vector<1x32x32xbf16> to vector<32x32xbf16>
    %c1_25 = arith.constant 1 : index
    %c0_26 = arith.constant 0 : index
    %c0_27 = arith.constant 0 : index
    %31 = vector.load %arg5[%c1_25, %c0_26, %c0_27] : memref<3x32x32xbf16, #tpu.memory_space<vmem>>, vector<1x32x32xbf16>
    %32 = vector.shape_cast %31 : vector<1x32x32xbf16> to vector<32x32xbf16>
    %cst_28 = arith.constant dense<0.000000e+00> : vector<16x32xf32>
    %33 = tpu.matmul %2, %30, %cst_28 {dimension_numbers = #tpu.dot_dimension_numbers<[1], [1], [0], [0], [0, 0, 1, 0], [], []>} : vector<16x32xbf16>, vector<32x32xbf16>, vector<16x32xf32> -> vector<16x32xf32>
    %cst_29 = arith.constant dense<0.000000e+00> : vector<16x32xf32>
    %34 = tpu.matmul %2, %32, %cst_29 {dimension_numbers = #tpu.dot_dimension_numbers<[1], [1], [0], [0], [0, 0, 1, 0], [], []>} : vector<16x32xbf16>, vector<32x32xbf16>, vector<16x32xf32> -> vector<16x32xf32>
    %cst_30 = arith.constant dense<0.000000e+00> : vector<16x32xf32>
    %35 = tpu.matmul %4, %30, %cst_30 {dimension_numbers = #tpu.dot_dimension_numbers<[1], [1], [0], [0], [0, 0, 1, 0], [], []>} : vector<16x32xbf16>, vector<32x32xbf16>, vector<16x32xf32> -> vector<16x32xf32>
    %cst_31 = arith.constant dense<0.000000e+00> : vector<16x32xf32>
    %36 = tpu.matmul %4, %32, %cst_31 {dimension_numbers = #tpu.dot_dimension_numbers<[1], [1], [0], [0], [0, 0, 1, 0], [], []>} : vector<16x32xbf16>, vector<32x32xbf16>, vector<16x32xf32> -> vector<16x32xf32>
    %37 = vector.broadcast %0 : f32 to vector<16x32xf32>
    %38 = arith.mulf %37, %36 : vector<16x32xf32>
    %39 = arith.addf %33, %38 : vector<16x32xf32>
    %c1_32 = arith.constant 1 : index
    %c0_33 = arith.constant 0 : index
    %c0_34 = arith.constant 0 : index
    %40 = vector.load %arg6[%c1_32, %c0_33, %c0_34] : memref<3x1x32xf32, #tpu.memory_space<vmem>>, vector<1x1x32xf32>
    %41 = vector.shape_cast %40 : vector<1x1x32xf32> to vector<1x32xf32>
    %42 = vector.broadcast %41 : vector<1x32xf32> to vector<16x32xf32>
    %43 = arith.addf %39, %42 : vector<16x32xf32>
    %44 = arith.truncf %43 : vector<16x32xf32> to vector<16x32xbf16>
    %c0_35 = arith.constant 0 : index
    %c0_36 = arith.constant 0 : index
    %45 = vector.load %arg10[%c0_35, %c0_36] : memref<16x32xbf16, #tpu.memory_space<vmem>>, vector<16x32xbf16>
    tpu.vector_store %arg10[%c0_35, %c0_36], %44 {strides = array<i32>} : memref<16x32xbf16, #tpu.memory_space<vmem>>, vector<16x32xbf16>,
    %46 = arith.addf %34, %35 : vector<16x32xf32>
    %c1_37 = arith.constant 1 : index
    %c0_38 = arith.constant 0 : index
    %c0_39 = arith.constant 0 : index
    %47 = vector.load %arg7[%c1_37, %c0_38, %c0_39] : memref<3x1x32xf32, #tpu.memory_space<vmem>>, vector<1x1x32xf32>
    %48 = vector.shape_cast %47 : vector<1x1x32xf32> to vector<1x32xf32>
    %49 = vector.broadcast %48 : vector<1x32xf32> to vector<16x32xf32>
    %50 = arith.addf %46, %49 : vector<16x32xf32>
    %51 = arith.truncf %50 : vector<16x32xf32> to vector<16x32xbf16>
    %c0_40 = arith.constant 0 : index
    %c0_41 = arith.constant 0 : index
    %52 = vector.load %arg11[%c0_40, %c0_41] : memref<16x32xbf16, #tpu.memory_space<vmem>>, vector<16x32xbf16>
    tpu.vector_store %arg11[%c0_40, %c0_41], %51 {strides = array<i32>} : memref<16x32xbf16, #tpu.memory_space<vmem>>, vector<16x32xbf16>,
    %c2 = arith.constant 2 : index
    %c0_42 = arith.constant 0 : index
    %c0_43 = arith.constant 0 : index
    %53 = vector.load %arg4[%c2, %c0_42, %c0_43] : memref<3x32x32xbf16, #tpu.memory_space<vmem>>, vector<1x32x32xbf16>
    %54 = vector.shape_cast %53 : vector<1x32x32xbf16> to vector<32x32xbf16>
    %c2_44 = arith.constant 2 : index
    %c0_45 = arith.constant 0 : index
    %c0_46 = arith.constant 0 : index
    %55 = vector.load %arg5[%c2_44, %c0_45, %c0_46] : memref<3x32x32xbf16, #tpu.memory_space<vmem>>, vector<1x32x32xbf16>
    %56 = vector.shape_cast %55 : vector<1x32x32xbf16> to vector<32x32xbf16>
    %cst_47 = arith.constant dense<0.000000e+00> : vector<16x32xf32>
    %57 = tpu.matmul %2, %54, %cst_47 {dimension_numbers = #tpu.dot_dimension_numbers<[1], [1], [0], [0], [0, 0, 1, 0], [], []>} : vector<16x32xbf16>, vector<32x32xbf16>, vector<16x32xf32> -> vector<16x32xf32>
    %cst_48 = arith.constant dense<0.000000e+00> : vector<16x32xf32>
    %58 = tpu.matmul %2, %56, %cst_48 {dimension_numbers = #tpu.dot_dimension_numbers<[1], [1], [0], [0], [0, 0, 1, 0], [], []>} : vector<16x32xbf16>, vector<32x32xbf16>, vector<16x32xf32> -> vector<16x32xf32>
    %cst_49 = arith.constant dense<0.000000e+00> : vector<16x32xf32>
    %59 = tpu.matmul %4, %54, %cst_49 {dimension_numbers = #tpu.dot_dimension_numbers<[1], [1], [0], [0], [0, 0, 1, 0], [], []>} : vector<16x32xbf16>, vector<32x32xbf16>, vector<16x32xf32> -> vector<16x32xf32>
    %cst_50 = arith.constant dense<0.000000e+00> : vector<16x32xf32>
    %60 = tpu.matmul %4, %56, %cst_50 {dimension_numbers = #tpu.dot_dimension_numbers<[1], [1], [0], [0], [0, 0, 1, 0], [], []>} : vector<16x32xbf16>, vector<32x32xbf16>, vector<16x32xf32> -> vector<16x32xf32>
    %61 = vector.broadcast %0 : f32 to vector<16x32xf32>
    %62 = arith.mulf %61, %60 : vector<16x32xf32>
    %63 = arith.addf %57, %62 : vector<16x32xf32>
    %c2_51 = arith.constant 2 : index
    %c0_52 = arith.constant 0 : index
    %c0_53 = arith.constant 0 : index
    %64 = vector.load %arg6[%c2_51, %c0_52, %c0_53] : memref<3x1x32xf32, #tpu.memory_space<vmem>>, vector<1x1x32xf32>
    %65 = vector.shape_cast %64 : vector<1x1x32xf32> to vector<1x32xf32>
    %66 = vector.broadcast %65 : vector<1x32xf32> to vector<16x32xf32>
    %67 = arith.addf %63, %66 : vector<16x32xf32>
    %68 = arith.truncf %67 : vector<16x32xf32> to vector<16x32xbf16>
    %c0_54 = arith.constant 0 : index
    %c0_55 = arith.constant 0 : index
    %69 = vector.load %arg12[%c0_54, %c0_55] : memref<16x32xbf16, #tpu.memory_space<vmem>>, vector<16x32xbf16>
    tpu.vector_store %arg12[%c0_54, %c0_55], %68 {strides = array<i32>} : memref<16x32xbf16, #tpu.memory_space<vmem>>, vector<16x32xbf16>,
    %70 = arith.addf %58, %59 : vector<16x32xf32>
    %c2_56 = arith.constant 2 : index
    %c0_57 = arith.constant 0 : index
    %c0_58 = arith.constant 0 : index
    %71 = vector.load %arg7[%c2_56, %c0_57, %c0_58] : memref<3x1x32xf32, #tpu.memory_space<vmem>>, vector<1x1x32xf32>
    %72 = vector.shape_cast %71 : vector<1x1x32xf32> to vector<1x32xf32>
    %73 = vector.broadcast %72 : vector<1x32xf32> to vector<16x32xf32>
    %74 = arith.addf %70, %73 : vector<16x32xf32>
    %75 = arith.truncf %74 : vector<16x32xf32> to vector<16x32xbf16>
    %c0_59 = arith.constant 0 : index
    %c0_60 = arith.constant 0 : index
    %76 = vector.load %arg13[%c0_59, %c0_60] : memref<16x32xbf16, #tpu.memory_space<vmem>>, vector<16x32xbf16>
    tpu.vector_store %arg13[%c0_59, %c0_60], %75 {strides = array<i32>} : memref<16x32xbf16, #tpu.memory_space<vmem>>, vector<16x32xbf16>,
    return
  }
  func.func @transform_0(%arg0: i32) -> i32 {
    %c0_i32 = arith.constant 0 : i32
    %c0_i32_0 = arith.constant 0 : i32
    return %c0_i32 : i32
  }
  func.func @transform_1(%arg0: i32) -> (i32, i32) {
    %c0_i32 = arith.constant 0 : i32
    %c0_i32_0 = arith.constant 0 : i32
    return %arg0, %c0_i32 : i32, i32
  }
  func.func @transform_2(%arg0: i32) -> (i32, i32) {
    %c0_i32 = arith.constant 0 : i32
    %c0_i32_0 = arith.constant 0 : i32
    return %arg0, %c0_i32 : i32, i32
  }
  func.func @transform_3(%arg0: i32) -> (i32, i32, i32) {
    %c0_i32 = arith.constant 0 : i32
    %c0_i32_0 = arith.constant 0 : i32
    %c0_i32_1 = arith.constant 0 : i32
    %c0_i32_2 = arith.constant 0 : i32
    return %c0_i32, %c0_i32_0, %c0_i32_1 : i32, i32, i32
  }
  func.func @transform_4(%arg0: i32) -> (i32, i32, i32) {
    %c0_i32 = arith.constant 0 : i32
    %c0_i32_0 = arith.constant 0 : i32
    %c0_i32_1 = arith.constant 0 : i32
    %c0_i32_2 = arith.constant 0 : i32
    return %c0_i32, %c0_i32_0, %c0_i32_1 : i32, i32, i32
  }
  func.func @transform_5(%arg0: i32) -> (i32, i32, i32) {
    %c0_i32 = arith.constant 0 : i32
    %c0_i32_0 = arith.constant 0 : i32
    %c0_i32_1 = arith.constant 0 : i32
    %c0_i32_2 = arith.constant 0 : i32
    return %c0_i32, %c0_i32_0, %c0_i32_1 : i32, i32, i32
  }
  func.func @transform_6(%arg0: i32) -> (i32, i32, i32) {
    %c0_i32 = arith.constant 0 : i32
    %c0_i32_0 = arith.constant 0 : i32
    %c0_i32_1 = arith.constant 0 : i32
    %c0_i32_2 = arith.constant 0 : i32
    return %c0_i32, %c0_i32_0, %c0_i32_1 : i32, i32, i32
  }
  func.func @transform_7(%arg0: i32) -> (i32, i32) {
    %c0_i32 = arith.constant 0 : i32
    %c0_i32_0 = arith.constant 0 : i32
    return %arg0, %c0_i32 : i32, i32
  }
  func.func @transform_8(%arg0: i32) -> (i32, i32) {
    %c0_i32 = arith.constant 0 : i32
    %c0_i32_0 = arith.constant 0 : i32
    return %arg0, %c0_i32 : i32, i32
  }
  func.func @transform_9(%arg0: i32) -> (i32, i32) {
    %c0_i32 = arith.constant 0 : i32
    %c0_i32_0 = arith.constant 0 : i32
    return %arg0, %c0_i32 : i32, i32
  }
  func.func @transform_10(%arg0: i32) -> (i32, i32) {
    %c0_i32 = arith.constant 0 : i32
    %c0_i32_0 = arith.constant 0 : i32
    return %arg0, %c0_i32 : i32, i32
  }
  func.func @transform_11(%arg0: i32) -> (i32, i32) {
    %c0_i32 = arith.constant 0 : i32
    %c0_i32_0 = arith.constant 0 : i32
    return %arg0, %c0_i32 : i32, i32
  }
  func.func @transform_12(%arg0: i32) -> (i32, i32) {
    %c0_i32 = arith.constant 0 : i32
    %c0_i32_0 = arith.constant 0 : i32
    return %arg0, %c0_i32 : i32, i32
  }
}

</mosaic_0001>

<bundles_post_ra>
// kernel: tpu_custom_call.1
= control target key start
LH: loop header
LB: loop body
LE: loop exit
PB: predicated region body
PF: predicated region fallthrough
CT: control target
= control target key end

     0   :  { %19 = vsyncpa [#allocation4], 0  ;;  %s1634_s0 = inlined_call_operand.<no memory space> [shape: f32[1], index: 0, kind: input, shape index: {}]   ;;  %s1635_s1 = inlined_call_operand.hbm [shape: f32[16,32], index: 1, kind: input, shape index: {}]   ;;  %s1636_s2 = inlined_call_operand.hbm [shape: f32[16,32], index: 2, kind: input, shape index: {}]   ;;  %s1637_s3 = inlined_call_operand.hbm [shape: bf16[3,32,32], index: 3, kind: input, shape index: {}]   ;;  %s1638_s4 = inlined_call_operand.hbm [shape: bf16[3,32,32], index: 4, kind: input, shape index: {}]   ;;  %s1639_s5 = inlined_call_operand.vmem [shape: f32[3,1,32], index: 5, kind: input, shape index: {}]   ;;  %s1640_s6 = inlined_call_operand.vmem [shape: f32[3,1,32], index: 6, kind: input, shape index: {}]   ;;  %s1641_s7 = inlined_call_operand.hbm [shape: bf16[16,32], index: 7, kind: output, shape index: {0}]   ;;  %s1642_s8 = inlined_call_operand.hbm [shape: bf16[16,32], index: 8, kind: output, shape index: {1}]   ;;  %s1643_s9 = inlined_call_operand.hbm [shape: bf16[16,32], index: 9, kind: output, shape index: {2}]   ;;  %s1644_s10 = inlined_call_operand.hbm [shape: bf16[16,32], index: 10, kind: output, shape index: {3}]   ;;  %s1645_s11 = inlined_call_operand.hbm [shape: bf16[16,32], index: 11, kind: output, shape index: {4}]   ;;  %s1646_s12 = inlined_call_operand.hbm [shape: bf16[16,32], index: 12, kind: output, shape index: {5}]  }
   0x1   :  { %20 = vsyncpa [#allocation7], 0 }
   0x2   :  { %21 = vsyncpa [#allocation10], 0 }
   0x3   :  { %22 = vsyncpa [#allocation5], 0 }
   0x4   :  { %23 = vsyncpa [#allocation13], 0 }
   0x5   :  { %24 = vsyncpa [#allocation16], 0 }
   0x6   :  { %25 = vsyncpa [#allocation19], 0  ;;  %s1378_s21 = smov [#allocation6]   ;;  %s1379_s23 = smov [#allocation3]  }
   0x7   :  { %s45_s22 = sshll.u32 %s1378_s21, 4  ;;  %s33_s24 = sshll.u32 %s1379_s23, 4  ;;  %s46_s22 = int_to_ptr.vmem [resolvable:$true] %s45_s22  ;;  %s34_s24 = int_to_ptr.vmem [resolvable:$true] %s33_s24 }
   0x8   :  { %s1172_s25 = scalar_lea.vmem %s46_s22, 256  ;;  %p1177_p1 = scmp.lt.s32.totalorder %s46_s22, %s46_s22 }
   0x9   :  { %p1173_p0 = scmp.ne.s32.totalorder %s46_s22, %s1172_s25  ;;  %p1178_p2 = scmp.lt.s32.totalorder %s1172_s25, %s1172_s25 }
   0xb   :  { %p1179_p3 = por %p1178_p2, %p1177_p1 }
   0xd   :  { %p1180_p4 = pnand %p1179_p3, %p1173_p0 }
   0xf   :  { %1183 = shalt.err (!%p1180_p4)
}
  0x10   :  { %s1380_s26 = smov 128   ;;  %s1381_s27 = smov 8  }
  0x11   :  { %51 = dma.hbm_to_vmem [thread:$0]  %s1636_s2, 256, %s46_s22, [#allocation7], %s1380_s26, %s1380_s26, %s1381_s27  }
  0x12   :  { %s1192_s30 = scalar_lea.vmem %s34_s24, 256  ;;  %p1197_p6 = scmp.lt.s32.totalorder %s34_s24, %s34_s24 }
  0x13   :  { %p1193_p5 = scmp.ne.s32.totalorder %s34_s24, %s1192_s30  ;;  %p1198_p7 = scmp.lt.s32.totalorder %s1192_s30, %s1192_s30 }
  0x15   :  { %p1199_p8 = por %p1198_p7, %p1197_p6 }
  0x17   :  { %p1200_p9 = pnand %p1199_p8, %p1193_p5 }
  0x19   :  { %1203 = shalt.err (!%p1200_p9)
}
  0x1a   :  { %39 = dma.hbm_to_vmem [thread:$0]  %s1635_s1, 256, %s34_s24, [#allocation4], %s1380_s26, %s1380_s26, %s1381_s27  }
  0x1b   :  { %s1382_s15 = smov [#allocation8]  }
  0x1c   :  { %s57_s16 = sshll.u32 %s1382_s15, 4  ;;  %s58_s16 = int_to_ptr.vmem [resolvable:$true] %s57_s16 }
  0x1d   :  { %s1212_s17 = scalar_lea.vmem %s58_s16, 768  ;;  %p1217_p11 = scmp.lt.s32.totalorder %s58_s16, %s58_s16 }
  0x1e   :  { %p1213_p10 = scmp.ne.s32.totalorder %s58_s16, %s1212_s17  ;;  %p1218_p12 = scmp.lt.s32.totalorder %s1212_s17, %s1212_s17 }
  0x20   :  { %p1219_p13 = por %p1218_p12, %p1217_p11 }
  0x22   :  { %p1220_p0 = pnand %p1219_p13, %p1213_p10 }
  0x24   :  { %1223 = shalt.err (!%p1220_p0)
}
  0x25   :  { %s1383_s2 = smov 64   ;;  %s1384_s18 = smov 4  }
  0x26   :  { %63 = dma.hbm_to_vmem [thread:$0]  %s1637_s3, 768, %s58_s16, [#allocation7], %s1383_s2, %s1383_s2, %s1384_s18  }
  0x27   :  { %s1385_s1 = smov [#allocation9]  }
  0x28   :  { %s69_s21 = sshll.u32 %s1385_s1, 4  ;;  %s70_s21 = int_to_ptr.vmem [resolvable:$true] %s69_s21 }
  0x29   :  { %s1232_s22 = scalar_lea.vmem %s70_s21, 768  ;;  %p1237_p2 = scmp.lt.s32.totalorder %s70_s21, %s70_s21 }
  0x2a   :  { %p1233_p1 = scmp.ne.s32.totalorder %s70_s21, %s1232_s22  ;;  %p1238_p3 = scmp.lt.s32.totalorder %s1232_s22, %s1232_s22 }
  0x2c   :  { %p1239_p4 = por %p1238_p3, %p1237_p2 }
  0x2e   :  { %p1240_p5 = pnand %p1239_p4, %p1233_p1 }
  0x30   :  { %1243 = shalt.err (!%p1240_p5)
}
  0x31   :  { %75 = dma.hbm_to_vmem [thread:$0]  %s1638_s4, 768, %s70_s21, [#allocation10], %s1383_s2, %s1383_s2, %s1384_s18  }
  0x32   :  { %1364 = dma.done.wait [#allocation4], 256  }
  0x33   :  { %1365 = vsyncadd [#allocation4], 4294967040 }
  0x34   :  { %1366 = dma.done.wait [#allocation7], 1024  }
  0x35   :  { %1367 = vsyncadd [#allocation7], 4294966272 }
  0x36   :  { %1368 = dma.done.wait [#allocation10], 768  }
  0x37   :  { %1369 = vsyncadd [#allocation10], 4294966528  ;;  %v1386_v0 = vmov 0.0   ;;  %vm1387_vm0 = vmmov 0   ;;  %vm118_vm1 = vcmask 261120   ;;  %v1152_v1 = vld [vmem:[#allocation8 + $0x8] sm:$0xff]   ;;  %v1560_v39 = vstv %s1634_s0 }
  0x38   :  { %1040 = vmatprep.subr.bf16.mxu0 %v1386_v0  ;;  %1048 = vmatprep.subr.bf16.mxu1 %v1386_v0  ;;  %v1153_v2 = vld [vmem:[#allocation9 + $0x8] sm:$0xff]   ;;  %v126_v3 = vsel %vm118_vm1, %v1152_v1, 0  ;;  %v1154_v5 = vld [vmem:[#allocation8] sm:$0xff]   ;;  %v1155_v6 = vld [vmem:[#allocation9] sm:$0xff]   ;;  %vm290_vm2 = vcmask 257024   ;;  %s1388_s0 = smov [#allocation11]  }
  0x39   :  { %1044 = vmatprep.mubr.msk.bf16.mxu0 %vm1387_vm0, %v1386_v0  ;;  %1052 = vmatprep.mubr.msk.bf16.mxu1 %vm1387_vm0, %v1386_v0  ;;  %v183_v4 = vsel %vm118_vm1, %v1153_v2, 0  ;;  %v123_v7 = vsel %vm118_vm1, %v1154_v5, 0  ;;  %v180_v8 = vsel %vm118_vm1, %v1155_v6, 0  ;;  %v97_v9 = vld [vmem:[#allocation6] sm:$0xff]  ;;  %v98_v10 = vld [vmem:[#allocation6 + $0x8] sm:$0xff]  ;;  %v94_v12 = vld [vmem:[#allocation3] sm:$0xff] }
  0x3a   :  { %1041 = vmatpush3.bf16.xpose.msra.mxu0 %v126_v3  ;;  %1049 = vmatpush3.bf16.xpose.msra.mxu1 %v183_v4  ;;  %v1491_v11 = vpack.c.bf16 %v98_v10, %v97_v9  ;;  %v95_v13 = vld [vmem:[#allocation3 + $0x8] sm:$0xff]  ;;  %v1156_v14 = vld [vmem:[#allocation8 + $0x18] sm:$0xff]   ;;  %v1158_v19 = vld [vmem:[#allocation8 + $0x10] sm:$0xff]   ;;  %s854_s29 = sshll.u32 %s1388_s0, 4  ;;  %s1389_s30 = smov [#allocation12]   ;;  %s855_s29 = int_to_ptr.vmem [resolvable:$true] %s854_s29 }
  0x3b   :  { %1042 = vmatprep.subr.bf16.mxu0 %v1386_v0  ;;  %1050 = vmatprep.subr.bf16.mxu1 %v1386_v0  ;;  %v1157_v15 = vld [vmem:[#allocation9 + $0x18] sm:$0xff]   ;;  %v96_v16 = vpack.c.bf16 %v95_v13, %v94_v12  ;;  %v377_v17 = vsel %vm118_vm1, %v1156_v14, 0  ;;  %v1159_v20 = vld [vmem:[#allocation9 + $0x10] sm:$0xff]   ;;  %v374_v21 = vsel %vm118_vm1, %v1158_v19, 0  ;;  %v1161_v24 = vld [vmem:[#allocation9 + $0x28] sm:$0xff]   ;;  %s866_s13 = sshll.u32 %s1389_s30, 4  ;;  %p1249_p7 = scmp.lt.s32.totalorder %s855_s29, %s855_s29  ;;  %s867_s13 = int_to_ptr.vmem [resolvable:$true] %s866_s13 }
  0x3c   :  { %v434_v18 = vsel %vm118_vm1, %v1157_v15, 0  ;;  %v431_v22 = vsel %vm118_vm1, %v1159_v20, 0  ;;  %v1160_v23 = vld [vmem:[#allocation8 + $0x28] sm:$0xff]   ;;  %v682_v26 = vsel %vm118_vm1, %v1161_v24, 0  ;;  %v1162_v27 = vld [vmem:[#allocation8 + $0x20] sm:$0xff]   ;;  %v1163_v28 = vld [vmem:[#allocation9 + $0x20] sm:$0xff]  }
  0x3d   :  { %v625_v25 = vsel %vm118_vm1, %v1160_v23, 0  ;;  %v622_v29 = vsel %vm118_vm1, %v1162_v27, 0  ;;  %v679_v30 = vsel %vm118_vm1, %v1163_v28, 0  ;;  %v953_v42 = vld [vmem:[%s1639_s5] ss:$0 sm:$0xff]  ;;  %s1244_s14 = scalar_lea.vmem %s855_s29, 128 }
  0x3e   :  { %v957_v45 = vld [vmem:[%s1640_s6] ss:$0 sm:$0xff]  ;;  %p1245_p6 = scmp.ne.s32.totalorder %s855_s29, %s1244_s14  ;;  %p1250_p8 = scmp.lt.s32.totalorder %s1244_s14, %s1244_s14 }
  0x40   :  { %p1251_p9 = por %p1250_p8, %p1249_p7 }
  0x42   :  { %1043 = vmatpush3.bf16.xpose.msra.mxu0 %v123_v7  ;;  %1051 = vmatpush3.bf16.xpose.msra.mxu1 %v180_v8  ;;  %p1252_p10 = pnand %p1251_p9, %p1245_p6 }
  0x43   :  { %1056 = vmatprep.subr.bf16.mxu0 %v1386_v0  ;;  %1064 = vmatprep.subr.bf16.mxu1 %v1386_v0 }
  0x49   :  { %1045 = vmatmul.mubr.msk.bf16.vlgmr.msra.gmra.mxu0 %vm118_vm1, %v1491_v11  ;;  %1053 = vmatmul.mubr.msk.bf16.vlgmr.msra.gmra.mxu1 %vm118_vm1, %v1491_v11 }
  0x4a   :  { %1057 = vmatpush3.bf16.xpose.msra.mxu0 %v126_v3  ;;  %1065 = vmatpush3.bf16.xpose.msra.mxu1 %v183_v4 }
  0x4b   :  { %1058 = vmatprep.subr.bf16.mxu0 %v1386_v0  ;;  %1066 = vmatprep.subr.bf16.mxu1 %v1386_v0 }
  0x4c   :  { %1060 = vmatprep.mubr.msk.bf16.mxu0 %vm1387_vm0, %v1386_v0  ;;  %1068 = vmatprep.mubr.msk.bf16.mxu1 %vm1387_vm0, %v1386_v0 }
  0x52   :  { %1059 = vmatpush3.bf16.xpose.msra.mxu0 %v123_v7  ;;  %1067 = vmatpush3.bf16.xpose.msra.mxu1 %v180_v8 }
  0x53   :  { %1072 = vmatprep.subr.bf16.mxu0 %v1386_v0  ;;  %1080 = vmatprep.subr.bf16.mxu1 %v1386_v0 }
  0x59   :  { %1061 = vmatmul.mubr.msk.bf16.vlgmr.msra.gmra.mxu0 %vm118_vm1, %v96_v16  ;;  %1069 = vmatmul.mubr.msk.bf16.vlgmr.msra.gmra.mxu1 %vm118_vm1, %v96_v16 }
  0x5a   :  { %1073 = vmatpush3.bf16.xpose.msra.mxu0 %v377_v17  ;;  %1081 = vmatpush3.bf16.xpose.msra.mxu1 %v434_v18 }
  0x5b   :  { %1074 = vmatprep.subr.bf16.mxu0 %v1386_v0  ;;  %1082 = vmatprep.subr.bf16.mxu1 %v1386_v0 }
  0x5c   :  { %1076 = vmatprep.mubr.msk.bf16.mxu0 %vm1387_vm0, %v1386_v0  ;;  %1084 = vmatprep.mubr.msk.bf16.mxu1 %vm1387_vm0, %v1386_v0 }
  0x62   :  { %1075 = vmatpush3.bf16.xpose.msra.mxu0 %v374_v21  ;;  %1083 = vmatpush3.bf16.xpose.msra.mxu1 %v431_v22 }
  0x63   :  { %1088 = vmatprep.subr.bf16.mxu0 %v1386_v0  ;;  %1096 = vmatprep.subr.bf16.mxu1 %v1386_v0 }
  0x69   :  { %1077 = vmatmul.mubr.msk.bf16.vlgmr.msra.gmra.mxu0 %vm118_vm1, %v1491_v11  ;;  %1085 = vmatmul.mubr.msk.bf16.vlgmr.msra.gmra.mxu1 %vm118_vm1, %v1491_v11 }
  0x6a   :  { %1089 = vmatpush3.bf16.xpose.msra.mxu0 %v377_v17  ;;  %1097 = vmatpush3.bf16.xpose.msra.mxu1 %v434_v18 }
  0x6b   :  { %1090 = vmatprep.subr.bf16.mxu0 %v1386_v0  ;;  %1098 = vmatprep.subr.bf16.mxu1 %v1386_v0 }
  0x6c   :  { %1092 = vmatprep.mubr.msk.bf16.mxu0 %vm1387_vm0, %v1386_v0  ;;  %1100 = vmatprep.mubr.msk.bf16.mxu1 %vm1387_vm0, %v1386_v0 }
  0x72   :  { %1091 = vmatpush3.bf16.xpose.msra.mxu0 %v374_v21  ;;  %1099 = vmatpush3.bf16.xpose.msra.mxu1 %v431_v22 }
  0x73   :  { %1104 = vmatprep.subr.bf16.mxu0 %v1386_v0  ;;  %1112 = vmatprep.subr.bf16.mxu1 %v1386_v0 }
  0x79   :  { %1093 = vmatmul.mubr.msk.bf16.vlgmr.msra.gmra.mxu0 %vm118_vm1, %v96_v16  ;;  %1101 = vmatmul.mubr.msk.bf16.vlgmr.msra.gmra.mxu1 %vm118_vm1, %v96_v16 }
  0x7a   :  { %1105 = vmatpush3.bf16.xpose.msra.mxu0 %v625_v25  ;;  %1113 = vmatpush3.bf16.xpose.msra.mxu1 %v682_v26 }
  0x7b   :  { %1106 = vmatprep.subr.bf16.mxu0 %v1386_v0  ;;  %1114 = vmatprep.subr.bf16.mxu1 %v1386_v0 }
  0x7c   :  { %1108 = vmatprep.mubr.msk.bf16.mxu0 %vm1387_vm0, %v1386_v0  ;;  %1116 = vmatprep.mubr.msk.bf16.mxu1 %vm1387_vm0, %v1386_v0 }
  0x82   :  { %1107 = vmatpush3.bf16.xpose.msra.mxu0 %v622_v29  ;;  %1115 = vmatpush3.bf16.xpose.msra.mxu1 %v679_v30 }
  0x83   :  { %1120 = vmatprep.subr.bf16.mxu0 %v1386_v0  ;;  %1128 = vmatprep.subr.bf16.mxu1 %v1386_v0 }
  0x89   :  { %1109 = vmatmul.mubr.msk.bf16.vlgmr.msra.gmra.mxu0 %vm118_vm1, %v1491_v11  ;;  %1117 = vmatmul.mubr.msk.bf16.vlgmr.msra.gmra.mxu1 %vm118_vm1, %v1491_v11 }
  0x8a   :  { %1121 = vmatpush3.bf16.xpose.msra.mxu0 %v625_v25  ;;  %1129 = vmatpush3.bf16.xpose.msra.mxu1 %v682_v26 }
  0x8b   :  { %1122 = vmatprep.subr.bf16.mxu0 %v1386_v0  ;;  %1130 = vmatprep.subr.bf16.mxu1 %v1386_v0 }
  0x8c   :  { %1124 = vmatprep.mubr.msk.bf16.mxu0 %vm1387_vm0, %v1386_v0  ;;  %1132 = vmatprep.mubr.msk.bf16.mxu1 %vm1387_vm0, %v1386_v0 }
  0x92   :  { %1123 = vmatpush3.bf16.xpose.msra.mxu0 %v622_v29  ;;  %1131 = vmatpush3.bf16.xpose.msra.mxu1 %v679_v30 }
  0x99   :  { %1125 = vmatmul.mubr.msk.bf16.vlgmr.msra.gmra.mxu0 %vm118_vm1, %v96_v16  ;;  %1133 = vmatmul.mubr.msk.bf16.vlgmr.msra.gmra.mxu1 %vm118_vm1, %v96_v16 }
 0x109   :  { %v162_v31 = vpop.f32.mrf.mxu0  ;;  %v219_v32 = vpop.f32.mrf.mxu1 }
 0x10a   :  { %v227_v40 = vmul.f32 %v1560_v39, %v219_v32 }
 0x10b   :  { %v1046_v33 = vpop.f32.mrf.mxu0  ;;  %v1054_v34 = vpop.f32.mrf.mxu1 }
 0x10d   :  { %v165_v35 = vpop.f32.mrf.mxu0  ;;  %v222_v36 = vpop.f32.mrf.mxu1 }
 0x10e   :  { %v228_v48 = vmul.f32 %v1560_v39, %v222_v36 }
 0x10f   :  { %v1047_v37 = vpop.f32.mrf.mxu0  ;;  %v1055_v38 = vpop.f32.mrf.mxu1 }
 0x119   :  { %v266_v41 = vpop.f32.mrf.mxu0  ;;  %v327_v44 = vpop.f32.mrf.mxu1 }
 0x11a   :  { %v267_v43 = vadd.f32 %v266_v41, %v227_v40  ;;  %v328_v46 = vadd.f32 %v327_v44, %v162_v31 }
 0x11b   :  { %v1062_v47 = vpop.f32.mrf.mxu0  ;;  %v1070_v50 = vpop.f32.mrf.mxu1 }
 0x11c   :  { %v280_v49 = vadd.f32 %v953_v42, %v267_v43  ;;  %v341_v51 = vadd.f32 %v957_v45, %v328_v46 }
 0x11d   :  { %v269_v52 = vpop.f32.mrf.mxu0  ;;  %v330_v55 = vpop.f32.mrf.mxu1 }
 0x11e   :  { %v992_v53 = vpack.c.bf16 %v280_v49, %v280_v49  ;;  %v270_v54 = vadd.f32 %v269_v52, %v228_v48  ;;  %v994_v56 = vpack.c.bf16 %v341_v51, %v341_v51  ;;  %v331_v57 = vadd.f32 %v330_v55, %v165_v35 }
 0x11f   :  { %v1063_v58 = vpop.f32.mrf.mxu0  ;;  %v1071_v60 = vpop.f32.mrf.mxu1 }
 0x120   :  { %v281_v59 = vadd.f32 %v953_v42, %v270_v54  ;;  %291 = vst.msk [vmem:[#allocation11] sm:$0xf] %vm290_vm2, %v992_v53  ;;  %v342_v61 = vadd.f32 %v957_v45, %v331_v57  ;;  %351 = vst.msk [vmem:[#allocation12] sm:$0xf] %vm290_vm2, %v994_v56 }
 0x122   :  { %v993_v62 = vpack.c.bf16 %v281_v59, %v281_v59  ;;  %v995_v63 = vpack.c.bf16 %v342_v61, %v342_v61 }
 0x124   :  { %292 = vst.msk [vmem:[#allocation11 + $0x4] sm:$0xf] %vm290_vm2, %v993_v62  ;;  %352 = vst.msk [vmem:[#allocation12 + $0x4] sm:$0xf] %vm290_vm2, %v995_v63 }
 0x125   :  { %1255 = shalt.err (!%p1252_p10)
}
 0x126   :  { %860 = dma.vmem_to_hbm [thread:$0]  %s855_s29, 128, %s1641_s7, [#allocation5], %s1383_s2, %s1383_s2, %s1384_s18  }
 0x127   :  { %s1264_s17 = scalar_lea.vmem %s867_s13, 128  ;;  %p1269_p12 = scmp.lt.s32.totalorder %s867_s13, %s867_s13 }
 0x128   :  { %p1265_p11 = scmp.ne.s32.totalorder %s867_s13, %s1264_s17  ;;  %p1270_p13 = scmp.lt.s32.totalorder %s1264_s17, %s1264_s17 }
 0x12a   :  { %p1271_p0 = por %p1270_p13, %p1269_p12 }
 0x12c   :  { %p1272_p1 = pnand %p1271_p0, %p1265_p11 }
 0x12e   :  { %1275 = shalt.err (!%p1272_p1)
}
 0x12f   :  { %872 = dma.vmem_to_hbm [thread:$0]  %s867_s13, 128, %s1642_s8, [#allocation13], %s1383_s2, %s1383_s2, %s1384_s18   ;;  %v413_v0 = vpop.f32.mrf.mxu0  ;;  %v470_v1 = vpop.f32.mrf.mxu1 }
 0x130   :  { %v477_v8 = vmul.f32 %v470_v1, %v1560_v39  ;;  %v968_v10 = vld [vmem:[%s1639_s5 + $0x1] ss:$0 sm:$0xff]  ;;  %s1390_s8 = smov [#allocation14]   ;;  %s1391_s24 = smov [#allocation15]  }
 0x131   :  { %v1078_v2 = vpop.f32.mrf.mxu0  ;;  %v1086_v3 = vpop.f32.mrf.mxu1  ;;  %v973_v13 = vld [vmem:[%s1640_s6 + $0x1] ss:$0 sm:$0xff]  ;;  %s878_s23 = sshll.u32 %s1390_s8, 4  ;;  %s890_s3 = sshll.u32 %s1391_s24, 4  ;;  %s879_s23 = int_to_ptr.vmem [resolvable:$true] %s878_s23  ;;  %s891_s3 = int_to_ptr.vmem [resolvable:$true] %s890_s3 }
 0x132   :  { %s1284_s4 = scalar_lea.vmem %s879_s23, 128  ;;  %p1289_p3 = scmp.lt.s32.totalorder %s879_s23, %s879_s23 }
 0x133   :  { %v416_v4 = vpop.f32.mrf.mxu0  ;;  %v473_v5 = vpop.f32.mrf.mxu1  ;;  %p1285_p2 = scmp.ne.s32.totalorder %s879_s23, %s1284_s4  ;;  %p1290_p4 = scmp.lt.s32.totalorder %s1284_s4, %s1284_s4 }
 0x134   :  { %v478_v16 = vmul.f32 %v473_v5, %v1560_v39 }
 0x135   :  { %v1079_v6 = vpop.f32.mrf.mxu0  ;;  %v1087_v7 = vpop.f32.mrf.mxu1  ;;  %p1291_p5 = por %p1290_p4, %p1289_p3 }
 0x137   :  { %p1292_p6 = pnand %p1291_p5, %p1285_p2 }
 0x139   :  { %v513_v9 = vpop.f32.mrf.mxu0  ;;  %v574_v12 = vpop.f32.mrf.mxu1 }
 0x13a   :  { %v514_v11 = vadd.f32 %v513_v9, %v477_v8  ;;  %v575_v14 = vadd.f32 %v574_v12, %v413_v0 }
 0x13b   :  { %v1094_v15 = vpop.f32.mrf.mxu0  ;;  %v1102_v18 = vpop.f32.mrf.mxu1 }
 0x13c   :  { %v528_v17 = vadd.f32 %v968_v10, %v514_v11  ;;  %v589_v19 = vadd.f32 %v973_v13, %v575_v14 }
 0x13d   :  { %v516_v20 = vpop.f32.mrf.mxu0  ;;  %v577_v23 = vpop.f32.mrf.mxu1 }
 0x13e   :  { %v996_v21 = vpack.c.bf16 %v528_v17, %v528_v17  ;;  %v517_v22 = vadd.f32 %v516_v20, %v478_v16  ;;  %v998_v24 = vpack.c.bf16 %v589_v19, %v589_v19  ;;  %v578_v25 = vadd.f32 %v577_v23, %v416_v4 }
 0x13f   :  { %v1095_v26 = vpop.f32.mrf.mxu0  ;;  %v1103_v28 = vpop.f32.mrf.mxu1 }
 0x140   :  { %v529_v27 = vadd.f32 %v968_v10, %v517_v22  ;;  %538 = vst.msk [vmem:[#allocation14] sm:$0xf] %vm290_vm2, %v996_v21  ;;  %v590_v29 = vadd.f32 %v973_v13, %v578_v25  ;;  %599 = vst.msk [vmem:[#allocation15] sm:$0xf] %vm290_vm2, %v998_v24 }
 0x142   :  { %v997_v30 = vpack.c.bf16 %v529_v27, %v529_v27  ;;  %v999_v31 = vpack.c.bf16 %v590_v29, %v590_v29 }
 0x144   :  { %539 = vst.msk [vmem:[#allocation14 + $0x4] sm:$0xf] %vm290_vm2, %v997_v30  ;;  %600 = vst.msk [vmem:[#allocation15 + $0x4] sm:$0xf] %vm290_vm2, %v999_v31 }
 0x145   :  { %1295 = shalt.err (!%p1292_p6)
}
 0x146   :  { %884 = dma.vmem_to_hbm [thread:$0]  %s879_s23, 128, %s1643_s9, [#allocation13], %s1383_s2, %s1383_s2, %s1384_s18  }
 0x147   :  { %s1304_s27 = scalar_lea.vmem %s891_s3, 128  ;;  %p1309_p8 = scmp.lt.s32.totalorder %s891_s3, %s891_s3 }
 0x148   :  { %p1305_p7 = scmp.ne.s32.totalorder %s891_s3, %s1304_s27  ;;  %p1310_p9 = scmp.lt.s32.totalorder %s1304_s27, %s1304_s27 }
 0x14a   :  { %p1311_p10 = por %p1310_p9, %p1309_p8 }
 0x14c   :  { %p1312_p11 = pnand %p1311_p10, %p1305_p7 }
 0x14e   :  { %1315 = shalt.err (!%p1312_p11)
}
 0x14f   :  { %896 = dma.vmem_to_hbm [thread:$0]  %s891_s3, 128, %s1644_s10, [#allocation16], %s1383_s2, %s1383_s2, %s1384_s18   ;;  %v661_v32 = vpop.f32.mrf.mxu0  ;;  %v718_v33 = vpop.f32.mrf.mxu1 }
 0x150   :  { %v725_v41 = vmul.f32 %v718_v33, %v1560_v39  ;;  %v984_v43 = vld [vmem:[%s1639_s5 + $0x2] ss:$0 sm:$0xff]  ;;  %s1392_s5 = smov [#allocation17]  }
 0x151   :  { %v1110_v34 = vpop.f32.mrf.mxu0  ;;  %v1118_v35 = vpop.f32.mrf.mxu1  ;;  %v989_v46 = vld [vmem:[%s1640_s6 + $0x2] ss:$0 sm:$0xff]  ;;  %s902_s10 = sshll.u32 %s1392_s5, 4  ;;  %s1393_s6 = smov [#allocation18]   ;;  %s903_s10 = int_to_ptr.vmem [resolvable:$true] %s902_s10 }
 0x152   :  { %s914_s14 = sshll.u32 %s1393_s6, 4  ;;  %s1324_s15 = scalar_lea.vmem %s903_s10, 128  ;;  %s915_s14 = int_to_ptr.vmem [resolvable:$true] %s914_s14 }
 0x153   :  { %v664_v36 = vpop.f32.mrf.mxu0  ;;  %v721_v37 = vpop.f32.mrf.mxu1  ;;  %p1325_p12 = scmp.ne.s32.totalorder %s903_s10, %s1324_s15  ;;  %p1329_p13 = scmp.lt.s32.totalorder %s903_s10, %s903_s10 }
 0x154   :  { %v726_v49 = vmul.f32 %v721_v37, %v1560_v39  ;;  %p1330_p0 = scmp.lt.s32.totalorder %s1324_s15, %s1324_s15 }
 0x155   :  { %v1111_v38 = vpop.f32.mrf.mxu0  ;;  %v1119_v40 = vpop.f32.mrf.mxu1 }
 0x156   :  { %p1331_p1 = por %p1330_p0, %p1329_p13 }
 0x158   :  { %p1332_p2 = pnand %p1331_p1, %p1325_p12 }
 0x159   :  { %v761_v42 = vpop.f32.mrf.mxu0  ;;  %v822_v45 = vpop.f32.mrf.mxu1 }
 0x15a   :  { %v762_v44 = vadd.f32 %v761_v42, %v725_v41  ;;  %v823_v47 = vadd.f32 %v822_v45, %v661_v32 }
 0x15b   :  { %v1126_v48 = vpop.f32.mrf.mxu0  ;;  %v1134_v51 = vpop.f32.mrf.mxu1 }
 0x15c   :  { %v776_v50 = vadd.f32 %v984_v43, %v762_v44  ;;  %v837_v52 = vadd.f32 %v989_v46, %v823_v47 }
 0x15d   :  { %v764_v53 = vpop.f32.mrf.mxu0  ;;  %v825_v56 = vpop.f32.mrf.mxu1 }
 0x15e   :  { %v1000_v54 = vpack.c.bf16 %v776_v50, %v776_v50  ;;  %v765_v55 = vadd.f32 %v764_v53, %v726_v49  ;;  %v1002_v57 = vpack.c.bf16 %v837_v52, %v837_v52  ;;  %v826_v58 = vadd.f32 %v825_v56, %v664_v36 }
 0x15f   :  { %v1127_v59 = vpop.f32.mrf.mxu0  ;;  %v1135_v61 = vpop.f32.mrf.mxu1 }
 0x160   :  { %v777_v60 = vadd.f32 %v984_v43, %v765_v55  ;;  %786 = vst.msk [vmem:[#allocation17] sm:$0xf] %vm290_vm2, %v1000_v54  ;;  %v838_v62 = vadd.f32 %v989_v46, %v826_v58  ;;  %847 = vst.msk [vmem:[#allocation18] sm:$0xf] %vm290_vm2, %v1002_v57 }
 0x162   :  { %v1001_v39 = vpack.c.bf16 %v777_v60, %v777_v60  ;;  %v1003_v63 = vpack.c.bf16 %v838_v62, %v838_v62 }
 0x164   :  { %787 = vst.msk [vmem:[#allocation17 + $0x4] sm:$0xf] %vm290_vm2, %v1001_v39  ;;  %848 = vst.msk [vmem:[#allocation18 + $0x4] sm:$0xf] %vm290_vm2, %v1003_v63 }
 0x165   :  { %1335 = shalt.err (!%p1332_p2)
}
 0x166   :  { %908 = dma.vmem_to_hbm [thread:$0]  %s903_s10, 128, %s1645_s11, [#allocation16], %s1383_s2, %s1383_s2, %s1384_s18  }
 0x167   :  { %s1344_s19 = scalar_lea.vmem %s915_s14, 128  ;;  %p1349_p4 = scmp.lt.s32.totalorder %s915_s14, %s915_s14 }
 0x168   :  { %p1345_p3 = scmp.ne.s32.totalorder %s915_s14, %s1344_s19  ;;  %p1350_p5 = scmp.lt.s32.totalorder %s1344_s19, %s1344_s19 }
 0x16a   :  { %p1351_p6 = por %p1350_p5, %p1349_p4 }
 0x16c   :  { %p1352_p7 = pnand %p1351_p6, %p1345_p3 }
 0x16e   :  { %1355 = shalt.err (!%p1352_p7)
}
 0x16f   :  { %920 = dma.vmem_to_hbm [thread:$0]  %s915_s14, 128, %s1646_s12, [#allocation19], %s1383_s2, %s1383_s2, %s1384_s18  }
 0x170   :  { %1370 = dma.done.wait [#allocation5], 128  }
 0x171   :  { %1371 = vsyncadd [#allocation5], 4294967168 }
 0x172   :  { %1372 = dma.done.wait [#allocation13], 256  }
 0x173   :  { %1373 = vsyncadd [#allocation13], 4294967040 }
 0x174   :  { %1374 = dma.done.wait [#allocation16], 256  }
 0x175   :  { %1375 = vsyncadd [#allocation16], 4294967040 }
 0x176   :  { %1376 = dma.done.wait [#allocation19], 128  }
 0x177   :  { %1377 = vsyncadd [#allocation19], 4294967168 }
 0x178   :  { %939 = vsyncpa [#allocation4], 1 }
 0x179   :  { %940 = vsyncpa [#allocation7], 1 }
 0x17a   :  { %941 = vsyncpa [#allocation10], 1 }
 0x17b   :  { %942 = vsyncpa [#allocation5], 1 }
 0x17c   :  { %943 = vsyncpa [#allocation13], 1 }
 0x17d   :  { %944 = vsyncpa [#allocation16], 1 }
 0x17e   :  { %945 = vsyncpa [#allocation19], 1 }

</bundles_post_ra>
